<compile_context>
chip_gen: v7x
topology: tpu7x:2x2x1
jax: 0.10.0
libtpu: 0.0.40
codegen_flags: <defaults>
</compile_context>

<pallas_src>
import math

import jax
import jax.numpy as jnp
from jax.experimental import pallas as pl
from jax.experimental.pallas import tpu as pltpu


def _make_qknorm_kernel(use_seg_mean: bool):
    """Kernel normalizing one q tile and one k tile per grid step."""

    def _norm(x_ref, s_ref, m_ref, o_ref):
        x_dtype = x_ref.dtype
        x = x_ref[...].astype(jnp.float32)
        x2 = x * x
        if use_seg_mean:
            # Segmented mean over each packed head-dim group along the lane
            # axis, as one small MXU matmul (MXU is idle; kernel is HBM-bound).
            # HIGHEST precision keeps the f32 sum-of-squares exact instead of
            # the default reduced-precision bf16 passes.
            ms = jnp.dot(x2, m_ref[...],
                         preferred_element_type=jnp.float32,
                         precision=jax.lax.Precision.HIGHEST)
        else:
            ms = jnp.mean(x2, axis=-1, keepdims=True)
        rrms = jax.lax.rsqrt(ms + 1e-6)
        # Matches PyTorch RMSNorm: (x * rrms).to(x_dtype) * f32_scale; the
        # final cast happens via o_ref.dtype.
        y = (x * rrms).astype(x_dtype) * s_ref[...]
        o_ref[...] = y.astype(o_ref.dtype)

    if use_seg_mean:
        def kernel(q_ref, k_ref, qs_ref, ks_ref, m_ref, qo_ref, ko_ref):
            _norm(q_ref, qs_ref, m_ref, qo_ref)
            _norm(k_ref, ks_ref, m_ref, ko_ref)
    else:
        def kernel(q_ref, k_ref, qs_ref, ks_ref, qo_ref, ko_ref):
            _norm(q_ref, qs_ref, None, qo_ref)
            _norm(k_ref, ks_ref, None, ko_ref)

    return kernel


def _vmem_budget_bytes():
    """~3/4 of this chip's physical VMEM (48 MiB on v7x, 96 MiB on v5e/v6e)."""
    try:
        cap = int(pltpu.get_tpu_info().vmem_capacity_bytes)
    except Exception:  # conservative fallback sized for v7x's 64 MiB VMEM
        cap = 64 << 20
    return (cap * 3) // 4


def _pick_rows(n_rows, width, in_itemsizes, out_itemsizes, vmem_budget,
               const_bytes, max_tile_bytes):
    """Largest row tile that fits double-buffered in the VMEM budget, capped at
    max_tile_bytes per array, rounded to the sublane packing of the narrowest
    dtype.  The grid uses cdiv (ragged last block), so no divisibility of
    n_rows is required."""
    mult = max(8, 32 // min(min(in_itemsizes), min(out_itemsizes)))
    # 2x for double-buffering of every q/k input/output tile.
    bytes_per_row = 2 * width * (sum(in_itemsizes) + sum(out_itemsizes))
    usable = vmem_budget - 2 * const_bytes - (8 << 20)     # compiler headroom
    rows_vmem = max(mult, usable // bytes_per_row)
    rows_cap = max(mult, max_tile_bytes // (width * max(in_itemsizes)))
    rows = max(mult, (min(rows_vmem, rows_cap) // mult) * mult)
    if rows >= n_rows:
        return n_rows            # single full-extent block (always legal)
    return rows


def qknorm_pallas(q, k, query_scale, key_scale, *, out_dtype=None,
                  max_tile_bytes=8 << 20):
    """Fused RMSNorm of q and k over the last axis (per-feature f32 scales)."""
    assert q.shape == k.shape, "QKNorm expects q and k with identical shapes"
    orig_shape = q.shape
    D = orig_shape[-1]
    assert query_scale.shape == (D,) and key_scale.shape == (D,)
    N = math.prod(orig_shape[:-1])

    # Lane packing: present a lane-dense slab (width 128 when possible) so
    # output stores are unmasked full-lane vst's even for small head dims.
    # P is reduced to the largest power-of-two divisor of N so the reshape is
    # a free view (no HBM pad/copy of q or k).
    if D < 128 and 128 % D == 0:
        P = 128 // D
        while P > 1 and N % P != 0:
            P //= 2
    else:
        P = 1
    W = P * D
    n_rows = N // P

    q2d = q.reshape(n_rows, W)
    k2d = k.reshape(n_rows, W)
    qs = jnp.tile(query_scale.astype(jnp.float32).reshape(1, D), (1, P))
    ks = jnp.tile(key_scale.astype(jnp.float32).reshape(1, D), (1, P))

    # Strict torch semantics by default: (x*rrms).to(x_dtype) * f32 scale
    # promotes the result to f32.  Pass out_dtype (e.g. bf16) to keep outputs
    # narrow and cut write bandwidth when the consumer allows it.
    if out_dtype is not None:
        q_out_dtype = jnp.dtype(out_dtype)
        k_out_dtype = jnp.dtype(out_dtype)
    else:
        q_out_dtype = jnp.promote_types(q.dtype, jnp.float32)
        k_out_dtype = jnp.promote_types(k.dtype, jnp.float32)

    const_bytes = 2 * W * 4 + (W * W * 4 if P > 1 else 0)
    vmem_budget = _vmem_budget_bytes()
    rows = _pick_rows(
        n_rows, W,
        in_itemsizes=(q.dtype.itemsize, k.dtype.itemsize),
        out_itemsizes=(q_out_dtype.itemsize, k_out_dtype.itemsize),
        vmem_budget=vmem_budget, const_bytes=const_bytes,
        max_tile_bytes=max_tile_bytes)

    in_specs = [
        pl.BlockSpec((rows, W), lambda i: (i, 0)),      # q tile
        pl.BlockSpec((rows, W), lambda i: (i, 0)),      # k tile
        pl.BlockSpec((1, W), lambda i: (0, 0)),         # query scale (resident)
        pl.BlockSpec((1, W), lambda i: (0, 0)),         # key scale (resident)
    ]
    operands = [q2d, k2d, qs, ks]
    if P > 1:
        seg = jnp.arange(W, dtype=jnp.int32) // D
        seg_mean = (seg[:, None] == seg[None, :]).astype(jnp.float32) / D
        in_specs.append(pl.BlockSpec((W, W), lambda i: (0, 0)))
        operands.append(seg_mean)

    # Ragged last block: Pallas ignores OOB reads and masks OOB writes, so no
    # padding / slicing copies are ever needed.
    grid = (pl.cdiv(n_rows, rows),)

    qo, ko = pl.pallas_call(
        _make_qknorm_kernel(P > 1),
        out_shape=(
            jax.ShapeDtypeStruct((n_rows, W), q_out_dtype),
            jax.ShapeDtypeStruct((n_rows, W), k_out_dtype),
        ),
        grid_spec=pltpu.PrefetchScalarGridSpec(
            num_scalar_prefetch=0,
            grid=grid,
            in_specs=in_specs,
            out_specs=[
                pl.BlockSpec((rows, W), lambda i: (i, 0)),
                pl.BlockSpec((rows, W), lambda i: (i, 0)),
            ],
        ),
        compiler_params=pltpu.CompilerParams(
            # "parallel" lets the runtime shard the row axis across
            # TensorCores on multi-TC parts (v7x); single-TC parts ignore it.
            dimension_semantics=("parallel",),
            vmem_limit_bytes=int(vmem_budget),
        ),
    )(*operands)

    return qo.reshape(orig_shape), ko.reshape(orig_shape)


class QKNormPallas:
    """JAX/Pallas equivalent of the PyTorch QKNorm module."""

    def __init__(self, dim: int, out_dtype=None):
        # Deterministic init: nn.Parameter(torch.ones(dim)) for each norm.
        self.query_scale = jnp.ones((dim,), dtype=jnp.float32)
        self.key_scale = jnp.ones((dim,), dtype=jnp.float32)
        self.out_dtype = out_dtype

    def __call__(self, q, k):
        qn, kn = qknorm_pallas(q, k, self.query_scale, self.key_scale,
                               out_dtype=self.out_dtype)
        # PyTorch: return q.to(q), k.to(q)  -> k cast to q's dtype.
        return qn, kn.astype(qn.dtype)


def _rmsnorm_ref(x, scale):
    x32 = x.astype(jnp.float32)
    rrms = jax.lax.rsqrt(jnp.mean(x32 * x32, axis=-1, keepdims=True) + 1e-6)
    return (x32 * rrms).astype(x.dtype) * scale


if __name__ == "__main__":
    # Demo 1: D=32 exercises the lane-packing / segmented-mean path.
    key = jax.random.PRNGKey(0)
    B, H, L, D = 2, 4, 8, 32
    kq, kk = jax.random.split(key)
    q = jax.random.normal(kq, (B, H, L, D), dtype=jnp.float32)
    k = jax.random.normal(kk, (B, H, L, D), dtype=jnp.float32)

    module = QKNormPallas(D)
    q_out, k_out = module(q, k)
    jax.block_until_ready((q_out, k_out))

    q_ref = _rmsnorm_ref(q, module.query_scale)
    k_ref = _rmsnorm_ref(k, module.key_scale).astype(q_ref.dtype)
    assert jnp.allclose(q_out, q_ref, atol=1e-5, rtol=1e-5)
    assert jnp.allclose(k_out, k_ref, atol=1e-5, rtol=1e-5)

    # Demo 2: D=128 exercises the already-lane-dense, plain-mean path.
    B2, H2, L2, D2 = 1, 2, 8, 128
    kq2, kk2 = jax.random.split(jax.random.PRNGKey(1))
    q2 = jax.random.normal(kq2, (B2, H2, L2, D2), dtype=jnp.float32)
    k2 = jax.random.normal(kk2, (B2, H2, L2, D2), dtype=jnp.float32)
    module2 = QKNormPallas(D2)
    q2_out, k2_out = module2(q2, k2)
    jax.block_until_ready((q2_out, k2_out))
    assert jnp.allclose(q2_out, _rmsnorm_ref(q2, module2.query_scale),
                        atol=1e-5, rtol=1e-5)
    assert jnp.allclose(k2_out, _rmsnorm_ref(k2, module2.key_scale),
                        atol=1e-5, rtol=1e-5)

    # Demo 3: awkward row count + forced tiny tiles exercises the reduced
    # lane packing (P=2) and the ragged last block (no pad/slice copies).
    B3, H3, L3, D3 = 2, 3, 3, 32
    kq3, kk3 = jax.random.split(jax.random.PRNGKey(2))
    q3 = jax.random.normal(kq3, (B3, H3, L3, D3), dtype=jnp.float32)
    k3 = jax.random.normal(kk3, (B3, H3, L3, D3), dtype=jnp.float32)
    scale3 = jnp.ones((D3,), dtype=jnp.float32)
    q3_out, k3_out = qknorm_pallas(q3, k3, scale3, scale3, max_tile_bytes=2048)
    jax.block_until_ready((q3_out, k3_out))
    assert jnp.allclose(q3_out, _rmsnorm_ref(q3, scale3), atol=1e-5, rtol=1e-5)
    assert jnp.allclose(k3_out, _rmsnorm_ref(k3, scale3), atol=1e-5, rtol=1e-5)

    print("KERNEL_OK")
</pallas_src>

<mosaic_0001>
module attributes {stable_mosaic.version = 11 : i64} {
  func.func @kernel(%arg0: i32, %arg1: memref<16x128xf32, #tpu.memory_space<vmem>>, %arg2: memref<16x128xf32, #tpu.memory_space<vmem>>, %arg3: memref<1x128xf32, #tpu.memory_space<vmem>>, %arg4: memref<1x128xf32, #tpu.memory_space<vmem>>, %arg5: memref<128x128xf32, #tpu.memory_space<vmem>>, %arg6: memref<16x128xf32, #tpu.memory_space<vmem>>, %arg7: memref<16x128xf32, #tpu.memory_space<vmem>>) attributes {dimension_semantics = [#tpu.dimension_semantics<parallel>], iteration_bounds = array<i64: 1>, scalar_prefetch = 0 : i64, scratch_operands = 0 : i64, tpu.core_type = #tpu.core_type<tc>, window_params = [{transform_indices = @transform_0, window_bounds = array<i64: 16, 128>}, {transform_indices = @transform_1, window_bounds = array<i64: 16, 128>}, {pipeline_mode = #tpu.pipeline_mode<synchronous>, transform_indices = @transform_2, window_bounds = array<i64: 1, 128>}, {pipeline_mode = #tpu.pipeline_mode<synchronous>, transform_indices = @transform_3, window_bounds = array<i64: 1, 128>}, {pipeline_mode = #tpu.pipeline_mode<synchronous>, transform_indices = @transform_4, window_bounds = array<i64: 128, 128>}, {transform_indices = @transform_5, window_bounds = array<i64: 16, 128>}, {transform_indices = @transform_6, window_bounds = array<i64: 16, 128>}]} {
    %c0 = arith.constant 0 : index
    %c0_0 = arith.constant 0 : index
    %0 = vector.load %arg1[%c0, %c0_0] : memref<16x128xf32, #tpu.memory_space<vmem>>, vector<16x128xf32>
    %1 = arith.mulf %0, %0 : vector<16x128xf32>
    %c0_1 = arith.constant 0 : index
    %c0_2 = arith.constant 0 : index
    %2 = vector.load %arg5[%c0_1, %c0_2] : memref<128x128xf32, #tpu.memory_space<vmem>>, vector<128x128xf32>
    %cst = arith.constant dense<0.000000e+00> : vector<16x128xf32>
    %3 = tpu.matmul %1, %2, %cst {dimension_numbers = #tpu.dot_dimension_numbers<[1], [0], [0], [1], [0, 0, 1, 1], [], []>, precision = #tpu.contract_precision<fp32>} : vector<16x128xf32>, vector<128x128xf32>, vector<16x128xf32> -> vector<16x128xf32>
    %cst_3 = arith.constant 9.99999997E-7 : f32
    %4 = vector.broadcast %cst_3 : f32 to vector<16x128xf32>
    %5 = arith.addf %3, %4 : vector<16x128xf32>
    %6 = math.rsqrt %5 : vector<16x128xf32>
    %7 = arith.mulf %0, %6 : vector<16x128xf32>
    %c0_4 = arith.constant 0 : index
    %c0_5 = arith.constant 0 : index
    %8 = vector.load %arg3[%c0_4, %c0_5] : memref<1x128xf32, #tpu.memory_space<vmem>>, vector<1x128xf32>
    %9 = vector.broadcast %8 : vector<1x128xf32> to vector<16x128xf32>
    %10 = arith.mulf %7, %9 : vector<16x128xf32>
    %c0_6 = arith.constant 0 : index
    %c0_7 = arith.constant 0 : index
    %11 = vector.load %arg6[%c0_6, %c0_7] : memref<16x128xf32, #tpu.memory_space<vmem>>, vector<16x128xf32>
    tpu.vector_store %arg6[%c0_6, %c0_7], %10 {strides = array<i32>} : memref<16x128xf32, #tpu.memory_space<vmem>>, vector<16x128xf32>,
    %c0_8 = arith.constant 0 : index
    %c0_9 = arith.constant 0 : index
    %12 = vector.load %arg2[%c0_8, %c0_9] : memref<16x128xf32, #tpu.memory_space<vmem>>, vector<16x128xf32>
    %13 = arith.mulf %12, %12 : vector<16x128xf32>
    %c0_10 = arith.constant 0 : index
    %c0_11 = arith.constant 0 : index
    %14 = vector.load %arg5[%c0_10, %c0_11] : memref<128x128xf32, #tpu.memory_space<vmem>>, vector<128x128xf32>
    %cst_12 = arith.constant dense<0.000000e+00> : vector<16x128xf32>
    %15 = tpu.matmul %13, %14, %cst_12 {dimension_numbers = #tpu.dot_dimension_numbers<[1], [0], [0], [1], [0, 0, 1, 1], [], []>, precision = #tpu.contract_precision<fp32>} : vector<16x128xf32>, vector<128x128xf32>, vector<16x128xf32> -> vector<16x128xf32>
    %cst_13 = arith.constant 9.99999997E-7 : f32
    %16 = vector.broadcast %cst_13 : f32 to vector<16x128xf32>
    %17 = arith.addf %15, %16 : vector<16x128xf32>
    %18 = math.rsqrt %17 : vector<16x128xf32>
    %19 = arith.mulf %12, %18 : vector<16x128xf32>
    %c0_14 = arith.constant 0 : index
    %c0_15 = arith.constant 0 : index
    %20 = vector.load %arg4[%c0_14, %c0_15] : memref<1x128xf32, #tpu.memory_space<vmem>>, vector<1x128xf32>
    %21 = vector.broadcast %20 : vector<1x128xf32> to vector<16x128xf32>
    %22 = arith.mulf %19, %21 : vector<16x128xf32>
    %c0_16 = arith.constant 0 : index
    %c0_17 = arith.constant 0 : index
    %23 = vector.load %arg7[%c0_16, %c0_17] : memref<16x128xf32, #tpu.memory_space<vmem>>, vector<16x128xf32>
    tpu.vector_store %arg7[%c0_16, %c0_17], %22 {strides = array<i32>} : memref<16x128xf32, #tpu.memory_space<vmem>>, vector<16x128xf32>,
    return
  }
  func.func @transform_0(%arg0: i32) -> (i32, i32) {
    %c0_i32 = arith.constant 0 : i32
    %c0_i32_0 = arith.constant 0 : i32
    return %arg0, %c0_i32 : i32, i32
  }
  func.func @transform_1(%arg0: i32) -> (i32, i32) {
    %c0_i32 = arith.constant 0 : i32
    %c0_i32_0 = arith.constant 0 : i32
    return %arg0, %c0_i32 : i32, i32
  }
  func.func @transform_2(%arg0: i32) -> (i32, i32) {
    %c0_i32 = arith.constant 0 : i32
    %c0_i32_0 = arith.constant 0 : i32
    %c0_i32_1 = arith.constant 0 : i32
    return %c0_i32, %c0_i32_0 : i32, i32
  }
  func.func @transform_3(%arg0: i32) -> (i32, i32) {
    %c0_i32 = arith.constant 0 : i32
    %c0_i32_0 = arith.constant 0 : i32
    %c0_i32_1 = arith.constant 0 : i32
    return %c0_i32, %c0_i32_0 : i32, i32
  }
  func.func @transform_4(%arg0: i32) -> (i32, i32) {
    %c0_i32 = arith.constant 0 : i32
    %c0_i32_0 = arith.constant 0 : i32
    %c0_i32_1 = arith.constant 0 : i32
    return %c0_i32, %c0_i32_0 : i32, i32
  }
  func.func @transform_5(%arg0: i32) -> (i32, i32) {
    %c0_i32 = arith.constant 0 : i32
    %c0_i32_0 = arith.constant 0 : i32
    return %arg0, %c0_i32 : i32, i32
  }
  func.func @transform_6(%arg0: i32) -> (i32, i32) {
    %c0_i32 = arith.constant 0 : i32
    %c0_i32_0 = arith.constant 0 : i32
    return %arg0, %c0_i32 : i32, i32
  }
}

</mosaic_0001>

<bundles_post_ra>
// kernel: tpu_custom_call.1
= control target key start
LH: loop header
LB: loop body
LE: loop exit
PB: predicated region body
PF: predicated region fallthrough
CT: control target
= control target key end

     0   :  { %12 = vsyncpa [#allocation3], 0  ;;  %s3245_s0 = inlined_call_operand.hbm [shape: f32[16,128], index: 0, kind: input, shape index: {}]   ;;  %s3246_s1 = inlined_call_operand.hbm [shape: f32[16,128], index: 1, kind: input, shape index: {}]   ;;  %s3247_s2 = inlined_call_operand.vmem [shape: f32[1,128], index: 2, kind: input, shape index: {}]   ;;  %s3248_s3 = inlined_call_operand.vmem [shape: f32[1,128], index: 3, kind: input, shape index: {}]   ;;  %s3249_s4 = inlined_call_operand.hbm [shape: f32[128,128], index: 4, kind: input, shape index: {}]   ;;  %s3250_s5 = inlined_call_operand.hbm [shape: f32[16,128], index: 5, kind: output, shape index: {0}]   ;;  %s3251_s6 = inlined_call_operand.hbm [shape: f32[16,128], index: 6, kind: output, shape index: {1}]  }
   0x1   :  { %13 = vsyncpa [#allocation6], 0 }
   0x2   :  { %14 = vsyncpa [#allocation4], 0 }
   0x3   :  { %15 = vsyncpa [#allocation10], 0  ;;  %s2716_s21 = smov [#allocation5]   ;;  %s2717_s23 = smov [#allocation2]  }
   0x4   :  { %s33_s22 = sshll.u32 %s2716_s21, 4  ;;  %s21_s24 = sshll.u32 %s2717_s23, 4  ;;  %s34_s22 = int_to_ptr.vmem [resolvable:$true] %s33_s22  ;;  %s2758_s24 = int_to_ptr.vmem [resolvable:$true] %s21_s24 }
   0x5   :  { %s2598_s27 = scalar_lea.hbm %s3246_s1, 256 }
   0x6   :  { %p2599_p0 = scmp.ne.s32.totalorder %s3246_s1, %s2598_s27  ;;  %p2602_p1 = scmp.lt.u32.totalorder %s2598_s27, %s3246_s1 }
   0x8   :  { %p2604_p2 = pnand %p2602_p1, %p2599_p0 }
   0xa   :  { %2607 = shalt.err (!%p2604_p2)
}
   0xb   :  { %s2608_s8 = scalar_lea.vmem %s34_s22, 256  ;;  %p2613_p4 = scmp.lt.s32.totalorder %s34_s22, %s34_s22 }
   0xc   :  { %p2609_p3 = scmp.ne.s32.totalorder %s34_s22, %s2608_s8  ;;  %p2614_p5 = scmp.lt.s32.totalorder %s2608_s8, %s2608_s8 }
   0xe   :  { %p2615_p6 = por %p2614_p5, %p2613_p4 }
  0x10   :  { %p2616_p7 = pnand %p2615_p6, %p2609_p3 }
  0x12   :  { %2619 = shalt.err (!%p2616_p7)
}
  0x13   :  { %s2718_s9 = smov 128   ;;  %s2719_s10 = smov 8  }
  0x14   :  { %39 = dma.hbm_to_vmem [thread:$0]  %s3246_s1, 256, %s34_s22, [#allocation6], %s2718_s9, %s2718_s9, %s2719_s10  }
  0x15   :  { %s2620_s15 = scalar_lea.hbm %s3245_s0, 256 }
  0x16   :  { %p2621_p8 = scmp.ne.s32.totalorder %s3245_s0, %s2620_s15  ;;  %p2624_p9 = scmp.lt.u32.totalorder %s2620_s15, %s3245_s0 }
  0x18   :  { %p2626_p10 = pnand %p2624_p9, %p2621_p8 }
  0x1a   :  { %2629 = shalt.err (!%p2626_p10)
}
  0x1b   :  { %s2630_s20 = scalar_lea.vmem %s2758_s24, 256  ;;  %p2635_p12 = scmp.lt.s32.totalorder %s2758_s24, %s2758_s24 }
  0x1c   :  { %p2631_p11 = scmp.ne.s32.totalorder %s2758_s24, %s2630_s20  ;;  %p2636_p13 = scmp.lt.s32.totalorder %s2630_s20, %s2630_s20 }
  0x1e   :  { %p2637_p0 = por %p2636_p13, %p2635_p12 }
  0x20   :  { %p2638_p1 = pnand %p2637_p0, %p2631_p11 }
  0x22   :  { %2641 = shalt.err (!%p2638_p1)
}
  0x23   :  { %27 = dma.hbm_to_vmem [thread:$0]  %s3245_s0, 256, %s2758_s24, [#allocation3], %s2718_s9, %s2718_s9, %s2719_s10  }
  0x24   :  { %s2720_s22 = smov [#allocation7]   ;;  %s2642_s27 = scalar_lea.hbm %s3249_s4, 2048 }
  0x25   :  { %s49_s23 = sshll.u32 %s2720_s22, 4  ;;  %p2643_p2 = scmp.ne.s32.totalorder %s3249_s4, %s2642_s27  ;;  %s50_s23 = int_to_ptr.vmem [resolvable:$true] %s49_s23 }
  0x26   :  { %p2646_p3 = scmp.lt.u32.totalorder %s2642_s27, %s3249_s4 }
  0x28   :  { %p2648_p4 = pnand %p2646_p3, %p2643_p2 }
  0x2a   :  { %2651 = shalt.err (!%p2648_p4)
}
  0x2b   :  { %s2652_s8 = scalar_lea.vmem %s50_s23, 2048  ;;  %p2657_p6 = scmp.lt.s32.totalorder %s50_s23, %s50_s23 }
  0x2c   :  { %p2653_p5 = scmp.ne.s32.totalorder %s50_s23, %s2652_s8  ;;  %p2658_p7 = scmp.lt.s32.totalorder %s2652_s8, %s2652_s8 }
  0x2e   :  { %p2659_p8 = por %p2658_p7, %p2657_p6 }
  0x30   :  { %p2660_p9 = pnand %p2659_p8, %p2653_p5 }
  0x32   :  { %2663 = shalt.err (!%p2660_p9)
}
  0x33   :  { %55 = dma.hbm_to_vmem [thread:$0]  %s3249_s4, 2048, %s50_s23, [#allocation6], %s2718_s9, %s2718_s9, %s2719_s10  }
  0x34   :  { %2708 = dma.done.wait [#allocation3], 256  }
  0x35   :  { %2709 = vsyncadd [#allocation3], 4294967040 }
  0x36   :  { %2710 = dma.done.wait [#allocation6], 2304  }
  0x37   :  { %2711 = vsyncadd [#allocation6], 4294964992  ;;  %v69_v0 = vld [vmem:[#allocation7] sm:$0xff]  ;;  %v70_v1 = vld [vmem:[#allocation7 + $0x8] sm:$0xff]  ;;  %s2721_s14 = smov [#allocation8]   ;;  %s2722_s16 = smov [#allocation9]  }
  0x38   :  { %v71_v2 = vld [vmem:[#allocation7 + $0x10] sm:$0xff]  ;;  %v86_v3 = vand.u32 4294901760, %v69_v0  ;;  %v89_v4 = vand.u32 4294901760, %v70_v1  ;;  %v72_v5 = vld [vmem:[#allocation7 + $0x18] sm:$0xff]  ;;  %v2810_v7 = vld [vmem:[#allocation7 + $0x20] sm:$0xff]  ;;  %s1508_s15 = sshll.u32 %s2721_s14, 4  ;;  %s1509_s15 = int_to_ptr.vmem [resolvable:$true] %s1508_s15 }
  0x39   :  { %v92_v6 = vand.u32 4294901760, %v71_v2  ;;  %v2812_v8 = vld [vmem:[#allocation7 + $0x28] sm:$0xff]  ;;  %v95_v9 = vand.u32 4294901760, %v72_v5  ;;  %v98_v11 = vand.u32 4294901760, %v2810_v7  ;;  %v2820_v14 = vld [vmem:[#allocation7 + $0x30] sm:$0xff]  ;;  %v2822_v15 = vld [vmem:[#allocation7 + $0x38] sm:$0xff]  ;;  %p2669_p11 = scmp.lt.s32.totalorder %s1509_s15, %s1509_s15 }
  0x3a   :  { %v2814_v10 = vpack.c.bf16 %v89_v4, %v86_v3  ;;  %v101_v12 = vand.u32 4294901760, %v2812_v8  ;;  %v2826_v16 = vld [vmem:[#allocation2] sm:$0xff]  ;;  %v2828_v17 = vld [vmem:[#allocation5] sm:$0xff]  ;;  %v2834_v19 = vld [vmem:[#allocation2 + $0x8] sm:$0xff]  ;;  %v104_v21 = vand.u32 4294901760, %v2820_v14  ;;  %v107_v22 = vand.u32 4294901760, %v2822_v15 }
  0x3b   :  { %v2818_v13 = vpack.c.bf16 %v95_v9, %v92_v6  ;;  %3260 = vst [vmem:[#allocation15_spill] sm:$0xff] %v2826_v16  ;;  %3261 = vst [vmem:[#allocation16_spill] sm:$0xff] %v2828_v17  ;;  %v67_v18 = vmul.f32 %v2826_v16, %v2826_v16  ;;  %v2846_v23 = vld [vmem:[#allocation5 + $0x8] sm:$0xff]  ;;  %v2848_v24 = vld [vmem:[#allocation7 + $0x40] sm:$0xff]  ;;  %v786_v27 = vmul.f32 %v2828_v17, %v2828_v17  ;;  %s1520_s17 = sshll.u32 %s2722_s16, 4  ;;  %s3208_s17 = int_to_ptr.vmem [resolvable:$true] %s1520_s17 }
  0x3c   :  { %2176 = vmatprep.subr.bf16.mxu0 %v2814_v10  ;;  %2368 = vmatprep.subr.bf16.mxu1 %v2814_v10  ;;  %v2842_v20 = vpack.c.bf16 %v101_v12, %v98_v11  ;;  %v2850_v25 = vld [vmem:[#allocation7 + $0x48] sm:$0xff]  ;;  %v68_v28 = vmul.f32 %v2834_v19, %v2834_v19  ;;  %v787_v31 = vmul.f32 %v2846_v23, %v2846_v23  ;;  %v110_v33 = vand.u32 4294901760, %v2848_v24  ;;  %v2877_v35 = vld [vmem:[#allocation7 + $0x50] sm:$0xff]  ;;  %v2879_v36 = vld [vmem:[#allocation7 + $0x58] sm:$0xff] }
  0x3d   :  { %2178 = vmatpush3.bf16.msra.mxu0 %v2814_v10  ;;  %2370 = vmatpush3.bf16.msra.mxu1 %v2814_v10  ;;  %v2852_v26 = vand.u32 4294901760, %v67_v18  ;;  %v2863_v30 = vand.u32 4294901760, %v786_v27  ;;  %v2873_v32 = vpack.c.bf16 %v107_v22, %v104_v21  ;;  %v113_v34 = vand.u32 4294901760, %v2850_v25  ;;  %v81_v50 = vld [vmem:[#allocation7 + $0x60] sm:$0xff]  ;;  %v82_v51 = vld [vmem:[#allocation7 + $0x68] sm:$0xff]  ;;  %v83_v55 = vld [vmem:[#allocation7 + $0x70] sm:$0xff] }
  0x3e   :  { %2180 = vmatprep.subr.bf16.mxu0 %v2818_v13  ;;  %2372 = vmatprep.subr.bf16.mxu1 %v2818_v13  ;;  %v2882_v38 = vsub.f32 %v69_v0, %v86_v3  ;;  %v2887_v40 = vsub.f32 %v70_v1, %v89_v4  ;;  %v2889_v41 = vand.u32 4294901760, %v68_v28  ;;  %v2891_v42 = vsub.f32 %v71_v2, %v92_v6  ;;  %v84_v56 = vld [vmem:[#allocation7 + $0x78] sm:$0xff] }
  0x3f   :  { %v2861_v29 = vsub.f32 %v67_v18, %v2852_v26  ;;  %v2885_v39 = vsub.f32 %v786_v27, %v2863_v30  ;;  %v2893_v43 = vsub.f32 %v72_v5, %v95_v9  ;;  %v2901_v46 = vand.u32 4294901760, %v787_v31 }
  0x40   :  { %v2909_v47 = vpack.c.bf16 %v113_v34, %v110_v33  ;;  %v116_v48 = vand.u32 4294901760, %v2877_v35  ;;  %v119_v49 = vand.u32 4294901760, %v2879_v36  ;;  %v189_v53 = vand.u32 4294901760, %v2882_v38 }
  0x41   :  { %2182 = vmatpush3.bf16.msra.mxu0 %v2818_v13  ;;  %2374 = vmatpush3.bf16.msra.mxu1 %v2818_v13  ;;  %v3255_v37 = vand.u32 4294901760, %v2861_v29  ;;  %v3252_v45 = vand.u32 4294901760, %v2885_v39  ;;  %v196_v57 = vand.u32 4294901760, %v2887_v40  ;;  %v2919_v58 = vsub.f32 %v68_v28, %v2889_v41 }
  0x42   :  { %2184 = vmatprep.subr.bf16.mxu0 %v2842_v20  ;;  %2376 = vmatprep.subr.bf16.mxu1 %v2842_v20  ;;  %v3257_v59 = vand.u32 4294901760, %v2891_v42  ;;  %v3256_v60 = vand.u32 4294901760, %v2893_v43  ;;  %v2926_v62 = vsub.f32 %v787_v31, %v2901_v46  ;;  %v2930_v63 = vpack.c.bf16 %v119_v49, %v116_v48 }
  0x43   :  { %v169_v44 = vsub.f32 %v2861_v29, %v3255_v37  ;;  %v888_v54 = vsub.f32 %v2885_v39, %v3252_v45  ;;  %v122_v0 = vand.u32 4294901760, %v81_v50  ;;  %v125_v1 = vand.u32 4294901760, %v82_v51 }
  0x44   :  { %v128_v2 = vand.u32 4294901760, %v83_v55  ;;  %v131_v3 = vand.u32 4294901760, %v84_v56  ;;  %v190_v4 = vsub.f32 %v2882_v38, %v189_v53  ;;  %v197_v5 = vsub.f32 %v2887_v40, %v196_v57 }
  0x45   :  { %2186 = vmatpush3.bf16.msra.mxu0 %v2842_v20  ;;  %2378 = vmatpush3.bf16.msra.mxu1 %v2842_v20  ;;  %v170_v52 = vand.u32 4294901760, %v169_v44  ;;  %v889_v61 = vand.u32 4294901760, %v888_v54  ;;  %v3254_v6 = vand.u32 4294901760, %v2919_v58  ;;  %v204_v9 = vsub.f32 %v2891_v42, %v3257_v59 }
  0x46   :  { %2188 = vmatprep.subr.bf16.mxu0 %v2873_v32  ;;  %2380 = vmatprep.subr.bf16.mxu1 %v2873_v32  ;;  %v211_v18 = vsub.f32 %v2893_v43, %v3256_v60  ;;  %v3253_v27 = vand.u32 4294901760, %v2926_v62  ;;  %v2951_v28 = vsub.f32 %v2810_v7, %v98_v11  ;;  %v2956_v31 = vsub.f32 %v2812_v8, %v101_v12 }
  0x47   :  { %1787 = vmatprep.mubr.f32.mxu0 %v170_v52  ;;  %1997 = vmatprep.mubr.f32.mxu1 %v889_v61  ;;  %v2960_v44 = vpack.c.bf16 %v125_v1, %v122_v0  ;;  %v2965_v52 = vsub.f32 %v2820_v14, %v104_v21  ;;  %v2967_v54 = vpack.c.bf16 %v131_v3, %v128_v2  ;;  %v191_v7 = vand.u32 4294901760, %v190_v4 }
  0x48   :  { %v198_v11 = vand.u32 4294901760, %v197_v5  ;;  %v179_v8 = vsub.f32 %v2919_v58, %v3254_v6  ;;  %v205_v12 = vand.u32 4294901760, %v204_v9  ;;  %v212_v61 = vand.u32 4294901760, %v211_v18 }
  0x49   :  { %2190 = vmatpush3.bf16.msra.mxu0 %v2873_v32  ;;  %2382 = vmatpush3.bf16.msra.mxu1 %v2873_v32  ;;  %v898_v45 = vsub.f32 %v2926_v62, %v3253_v27  ;;  %v217_v14 = vand.u32 4294901760, %v2951_v28  ;;  %v224_v21 = vand.u32 4294901760, %v2956_v31  ;;  %v2982_v4 = vsub.f32 %v2822_v15, %v107_v22 }
  0x4a   :  { %2192 = vmatprep.subr.bf16.mxu0 %v2909_v47  ;;  %2384 = vmatprep.subr.bf16.mxu1 %v2909_v47  ;;  %v231_v5 = vand.u32 4294901760, %v2965_v52  ;;  %v2990_v9 = vsub.f32 %v2848_v24, %v110_v33  ;;  %v2995_v18 = vsub.f32 %v2850_v25, %v113_v34  ;;  %v2998_v27 = vsub.f32 %v2877_v35, %v116_v48 }
  0x4b   :  { %v3001_v15 = vsub.f32 %v2879_v36, %v119_v49  ;;  %v3003_v22 = vsub.f32 %v81_v50, %v122_v0  ;;  %v3005_v6 = vsub.f32 %v82_v51, %v125_v1  ;;  %v3007_v37 = vsub.f32 %v83_v55, %v128_v2 }
  0x4c   :  { %v2207_v60 = vpack.c.bf16 %v198_v11, %v191_v7  ;;  %v180_v24 = vand.u32 4294901760, %v179_v8  ;;  %v2211_v33 = vpack.c.bf16 %v212_v61, %v205_v12  ;;  %v3009_v59 = vsub.f32 %v84_v56, %v131_v3 }
  0x4d   :  { %2194 = vmatpush3.bf16.msra.mxu0 %v2909_v47  ;;  %2386 = vmatpush3.bf16.msra.mxu1 %v2909_v47  ;;  %v899_v25 = vand.u32 4294901760, %v898_v45  ;;  %v218_v34 = vsub.f32 %v2951_v28, %v217_v14  ;;  %v225_v35 = vsub.f32 %v2956_v31, %v224_v21  ;;  %v238_v36 = vand.u32 4294901760, %v2982_v4 }
  0x4e   :  { %2196 = vmatprep.subr.bf16.mxu0 %v2930_v63  ;;  %2388 = vmatprep.subr.bf16.mxu1 %v2930_v63  ;;  %v232_v48 = vsub.f32 %v2965_v52, %v231_v5  ;;  %v245_v49 = vand.u32 4294901760, %v2990_v9  ;;  %v252_v50 = vand.u32 4294901760, %v2995_v18  ;;  %v259_v51 = vand.u32 4294901760, %v2998_v27 }
  0x4f   :  { %v266_v45 = vand.u32 4294901760, %v3001_v15  ;;  %v273_v55 = vand.u32 4294901760, %v3003_v22  ;;  %v280_v56 = vand.u32 4294901760, %v3005_v6  ;;  %v287_v0 = vand.u32 4294901760, %v3007_v37 }
  0x50   :  { %v294_v1 = vand.u32 4294901760, %v3009_v59  ;;  %v3031_v2 = vpack.c.bf16 %v196_v57, %v189_v53  ;;  %v3262_v3 = vand.u32 4294901760, %v2891_v42  ;;  %v3263_v7 = vand.u32 4294901760, %v2893_v43 }
  0x51   :  { %2198 = vmatpush3.bf16.msra.mxu0 %v2930_v63  ;;  %2390 = vmatpush3.bf16.msra.mxu1 %v2930_v63  ;;  %v3039_v8 = vpack.c.bf16 %v224_v21, %v217_v14  ;;  %v219_v12 = vand.u32 4294901760, %v218_v34  ;;  %v239_v61 = vsub.f32 %v2982_v4, %v238_v36  ;;  %v3044_v17 = vpack.c.bf16 %v238_v36, %v231_v5 }
  0x52   :  { %2200 = vmatprep.subr.bf16.mxu0 %v2960_v44  ;;  %2392 = vmatprep.subr.bf16.mxu1 %v2960_v44  ;;  %v3037_v11 = vpack.c.bf16 %v3263_v7, %v3262_v3  ;;  %v3046_v16 = vpack.c.bf16 %v252_v50, %v245_v49  ;;  %v226_v53 = vand.u32 4294901760, %v225_v35  ;;  %v3048_v57 = vpack.c.bf16 %v266_v45, %v259_v51 }
  0x53   :  { %v3050_v3 = vpack.c.bf16 %v280_v56, %v273_v55  ;;  %v3052_v14 = vpack.c.bf16 %v294_v1, %v287_v0  ;;  %v233_v21 = vand.u32 4294901760, %v232_v48  ;;  %v240_v34 = vand.u32 4294901760, %v239_v61 }
  0x54   :  { %v2215_v5 = vpack.c.bf16 %v226_v53, %v219_v12  ;;  %v246_v36 = vsub.f32 %v2990_v9, %v245_v49  ;;  %v253_v7 = vsub.f32 %v2995_v18, %v252_v50  ;;  %v274_v61 = vsub.f32 %v3003_v22, %v273_v55 }
  0x55   :  { %2202 = vmatpush3.bf16.msra.mxu0 %v2960_v44  ;;  %2394 = vmatpush3.bf16.msra.mxu1 %v2960_v44 }
  0x56   :  { %2204 = vmatprep.subr.bf16.mxu0 %v2967_v54  ;;  %2396 = vmatprep.subr.bf16.mxu1 %v2967_v54  ;;  %v247_v35 = vand.u32 4294901760, %v246_v36  ;;  %v254_v48 = vand.u32 4294901760, %v253_v7  ;;  %v2247_v7 = vpack.c.bf16 %v2956_v31, %v2951_v28  ;;  %v2267_v28 = vpack.c.bf16 %v3009_v59, %v3007_v37  ;;  %v3268_v31 = vld [vmem:[#allocation15_spill] sm:$0xff] }
  0x58   :  { %v2223_v50 = vpack.c.bf16 %v254_v48, %v247_v35 }
  0x59   :  { %2206 = vmatpush3.bf16.msra.mxu0 %v2967_v54  ;;  %2398 = vmatpush3.bf16.msra.mxu1 %v2967_v54 }
  0x5a   :  { %2208 = vmatprep.subr.bf16.mxu0 %v2207_v60  ;;  %2400 = vmatprep.subr.bf16.mxu1 %v2207_v60 }
  0x5c   :  { %1788 = vmatmul.mubr.f32.vlgmr.msra.gmra.mrb[0].mxu0 %v180_v24  ;;  %1998 = vmatmul.mubr.f32.vlgmr.msra.gmra.mrb[0].mxu1 %v899_v25  ;;  %v260_v24 = vsub.f32 %v2998_v27, %v259_v51  ;;  %v267_v25 = vsub.f32 %v3001_v15, %v266_v45  ;;  %v275_v45 = vand.u32 4294901760, %v274_v61 }
  0x5d   :  { %2210 = vmatpush3.bf16.msra.mxu0 %v2207_v60  ;;  %2402 = vmatpush3.bf16.msra.mxu1 %v2207_v60  ;;  %v2219_v60 = vpack.c.bf16 %v240_v34, %v233_v21  ;;  %v288_v21 = vsub.f32 %v3007_v37, %v287_v0  ;;  %v2239_v0 = vpack.c.bf16 %v2887_v40, %v2882_v38  ;;  %v3264_v37 = vand.u32 4294901760, %v2861_v29 }
  0x5e   :  { %2212 = vmatprep.subr.bf16.mxu0 %v2211_v33  ;;  %2404 = vmatprep.subr.bf16.mxu1 %v2211_v33  ;;  %v261_v49 = vand.u32 4294901760, %v260_v24  ;;  %v268_v12 = vand.u32 4294901760, %v267_v25  ;;  %v2251_v38 = vpack.c.bf16 %v2982_v4, %v2965_v52  ;;  %v2255_v40 = vpack.c.bf16 %v2995_v18, %v2990_v9 }
  0x5f   :  { %1822 = vmatprep.mubr.f32.mxu0 %v2852_v26  ;;  %2032 = vmatprep.mubr.f32.mxu1 %v2863_v30  ;;  %v289_v36 = vand.u32 4294901760, %v288_v21 }
  0x60   :  { %v2227_v51 = vpack.c.bf16 %v268_v12, %v261_v49 }
  0x61   :  { %2214 = vmatpush3.bf16.msra.mxu0 %v2211_v33  ;;  %2406 = vmatpush3.bf16.msra.mxu1 %v2211_v33  ;;  %v281_v33 = vsub.f32 %v3005_v6, %v280_v56 }
  0x62   :  { %2216 = vmatprep.subr.bf16.mxu0 %v2215_v5  ;;  %2408 = vmatprep.subr.bf16.mxu1 %v2215_v5 }
  0x63   :  { %v282_v53 = vand.u32 4294901760, %v281_v33 }
  0x65   :  { %2218 = vmatpush3.bf16.msra.mxu0 %v2215_v5  ;;  %2410 = vmatpush3.bf16.msra.mxu1 %v2215_v5  ;;  %v295_v5 = vsub.f32 %v3009_v59, %v294_v1  ;;  %v2231_v34 = vpack.c.bf16 %v282_v53, %v275_v45  ;;  %v2243_v1 = vpack.c.bf16 %v2893_v43, %v2891_v42  ;;  %v3265_v59 = vand.u32 4294901760, %v2885_v39 }
  0x66   :  { %2220 = vmatprep.subr.bf16.mxu0 %v2219_v60  ;;  %2412 = vmatprep.subr.bf16.mxu1 %v2219_v60  ;;  %v2259_v42 = vpack.c.bf16 %v3001_v15, %v2998_v27  ;;  %v2263_v43 = vpack.c.bf16 %v3005_v6, %v3003_v22 }
  0x67   :  { %v296_v55 = vand.u32 4294901760, %v295_v5 }
  0x69   :  { %2222 = vmatpush3.bf16.msra.mxu0 %v2219_v60  ;;  %2414 = vmatpush3.bf16.msra.mxu1 %v2219_v60  ;;  %v2235_v56 = vpack.c.bf16 %v296_v55, %v289_v36 }
  0x6a   :  { %2224 = vmatprep.subr.bf16.mxu0 %v2223_v50  ;;  %2416 = vmatprep.subr.bf16.mxu1 %v2223_v50 }
  0x6d   :  { %2226 = vmatpush3.bf16.msra.mxu0 %v2223_v50  ;;  %2418 = vmatpush3.bf16.msra.mxu1 %v2223_v50 }
  0x6e   :  { %2228 = vmatprep.subr.bf16.mxu0 %v2227_v51  ;;  %2420 = vmatprep.subr.bf16.mxu1 %v2227_v51 }
  0x71   :  { %2230 = vmatpush3.bf16.msra.mxu0 %v2227_v51  ;;  %2422 = vmatpush3.bf16.msra.mxu1 %v2227_v51 }
  0x72   :  { %2232 = vmatprep.subr.bf16.mxu0 %v2231_v34  ;;  %2424 = vmatprep.subr.bf16.mxu1 %v2231_v34 }
  0x75   :  { %2234 = vmatpush3.bf16.msra.mxu0 %v2231_v34  ;;  %2426 = vmatpush3.bf16.msra.mxu1 %v2231_v34 }
  0x76   :  { %2236 = vmatprep.subr.bf16.mxu0 %v2235_v56  ;;  %2428 = vmatprep.subr.bf16.mxu1 %v2235_v56 }
  0x79   :  { %2238 = vmatpush3.bf16.msra.mxu0 %v2235_v56  ;;  %2430 = vmatpush3.bf16.msra.mxu1 %v2235_v56 }
  0x7a   :  { %2240 = vmatprep.subr.bf16.mxu0 %v2239_v0  ;;  %2432 = vmatprep.subr.bf16.mxu1 %v2239_v0 }
  0x7c   :  { %1823 = vmatmul.mubr.f32.vlgmr.msra.gmra.mrb[0].mxu0 %v2889_v41  ;;  %2033 = vmatmul.mubr.f32.vlgmr.msra.gmra.mrb[0].mxu1 %v2901_v46 }
  0x7d   :  { %2242 = vmatpush3.bf16.msra.mxu0 %v2239_v0  ;;  %2434 = vmatpush3.bf16.msra.mxu1 %v2239_v0 }
  0x7e   :  { %2244 = vmatprep.subr.bf16.mxu0 %v2243_v1  ;;  %2436 = vmatprep.subr.bf16.mxu1 %v2243_v1 }
  0x7f   :  { %1857 = vmatprep.mubr.f32.mxu0 %v2861_v29  ;;  %2067 = vmatprep.mubr.f32.mxu1 %v2885_v39  ;;  %v3266_v29 = vand.u32 4294901760, %v2919_v58  ;;  %v3267_v39 = vand.u32 4294901760, %v2926_v62 }
  0x81   :  { %2246 = vmatpush3.bf16.msra.mxu0 %v2243_v1  ;;  %2438 = vmatpush3.bf16.msra.mxu1 %v2243_v1 }
  0x82   :  { %2248 = vmatprep.subr.bf16.mxu0 %v2247_v7  ;;  %2440 = vmatprep.subr.bf16.mxu1 %v2247_v7 }
  0x85   :  { %2250 = vmatpush3.bf16.msra.mxu0 %v2247_v7  ;;  %2442 = vmatpush3.bf16.msra.mxu1 %v2247_v7 }
  0x86   :  { %2252 = vmatprep.subr.bf16.mxu0 %v2251_v38  ;;  %2444 = vmatprep.subr.bf16.mxu1 %v2251_v38 }
  0x89   :  { %2254 = vmatpush3.bf16.msra.mxu0 %v2251_v38  ;;  %2446 = vmatpush3.bf16.msra.mxu1 %v2251_v38 }
  0x8a   :  { %2256 = vmatprep.subr.bf16.mxu0 %v2255_v40  ;;  %2448 = vmatprep.subr.bf16.mxu1 %v2255_v40 }
  0x8d   :  { %2258 = vmatpush3.bf16.msra.mxu0 %v2255_v40  ;;  %2450 = vmatpush3.bf16.msra.mxu1 %v2255_v40 }
  0x8e   :  { %2260 = vmatprep.subr.bf16.mxu0 %v2259_v42  ;;  %2452 = vmatprep.subr.bf16.mxu1 %v2259_v42 }
  0x91   :  { %2262 = vmatpush3.bf16.msra.mxu0 %v2259_v42  ;;  %2454 = vmatpush3.bf16.msra.mxu1 %v2259_v42 }
  0x92   :  { %2264 = vmatprep.subr.bf16.mxu0 %v2263_v43  ;;  %2456 = vmatprep.subr.bf16.mxu1 %v2263_v43 }
  0x95   :  { %2266 = vmatpush3.bf16.msra.mxu0 %v2263_v43  ;;  %2458 = vmatpush3.bf16.msra.mxu1 %v2263_v43 }
  0x96   :  { %2268 = vmatprep.subr.bf16.mxu0 %v2267_v28  ;;  %2460 = vmatprep.subr.bf16.mxu1 %v2267_v28 }
  0x99   :  { %2270 = vmatpush3.bf16.msra.mxu0 %v2267_v28  ;;  %2462 = vmatpush3.bf16.msra.mxu1 %v2267_v28 }
  0x9a   :  { %2272 = vmatprep.subr.bf16.mxu0 %v2814_v10  ;;  %2464 = vmatprep.subr.bf16.mxu1 %v2814_v10 }
  0x9c   :  { %1858 = vmatmul.mubr.f32.vlgmr.msra.gmra.mrb[0].mxu0 %v2919_v58  ;;  %2068 = vmatmul.mubr.f32.vlgmr.msra.gmra.mrb[0].mxu1 %v2926_v62  ;;  %v1537_v58 = vld [vmem:[%s3247_s2] ss:$0 sm:$0xff]  ;;  %s2664_s2 = scalar_lea.vmem %s1509_s15, 256 }
  0x9d   :  { %2274 = vmatpush3.bf16.msra.mxu0 %v2814_v10  ;;  %2466 = vmatpush3.bf16.msra.mxu1 %v2814_v10  ;;  %v1538_v62 = vld [vmem:[%s3248_s3] ss:$0 sm:$0xff]  ;;  %p2665_p10 = scmp.ne.s32.totalorder %s1509_s15, %s2664_s2  ;;  %p2670_p12 = scmp.lt.s32.totalorder %s2664_s2, %s2664_s2 }
  0x9e   :  { %2276 = vmatprep.subr.bf16.mxu0 %v2818_v13  ;;  %2468 = vmatprep.subr.bf16.mxu1 %v2818_v13 }
  0x9f   :  { %1892 = vmatprep.mubr.f32.mxu0 %v3264_v37  ;;  %2102 = vmatprep.mubr.f32.mxu1 %v3265_v59  ;;  %p2671_p13 = por %p2670_p12, %p2669_p11 }
  0xa1   :  { %2278 = vmatpush3.bf16.msra.mxu0 %v2818_v13  ;;  %2470 = vmatpush3.bf16.msra.mxu1 %v2818_v13  ;;  %p2672_p0 = pnand %p2671_p13, %p2665_p10 }
  0xa2   :  { %2280 = vmatprep.subr.bf16.mxu0 %v2842_v20  ;;  %2472 = vmatprep.subr.bf16.mxu1 %v2842_v20 }
  0xa5   :  { %2282 = vmatpush3.bf16.msra.mxu0 %v2842_v20  ;;  %2474 = vmatpush3.bf16.msra.mxu1 %v2842_v20 }
  0xa6   :  { %2284 = vmatprep.subr.bf16.mxu0 %v2873_v32  ;;  %2476 = vmatprep.subr.bf16.mxu1 %v2873_v32 }
  0xa9   :  { %2286 = vmatpush3.bf16.msra.mxu0 %v2873_v32  ;;  %2478 = vmatpush3.bf16.msra.mxu1 %v2873_v32 }
  0xaa   :  { %2288 = vmatprep.subr.bf16.mxu0 %v2909_v47  ;;  %2480 = vmatprep.subr.bf16.mxu1 %v2909_v47 }
  0xad   :  { %2290 = vmatpush3.bf16.msra.mxu0 %v2909_v47  ;;  %2482 = vmatpush3.bf16.msra.mxu1 %v2909_v47 }
  0xae   :  { %2292 = vmatprep.subr.bf16.mxu0 %v2930_v63  ;;  %2484 = vmatprep.subr.bf16.mxu1 %v2930_v63 }
  0xb1   :  { %2294 = vmatpush3.bf16.msra.mxu0 %v2930_v63  ;;  %2486 = vmatpush3.bf16.msra.mxu1 %v2930_v63 }
  0xb2   :  { %2296 = vmatprep.subr.bf16.mxu0 %v2960_v44  ;;  %2488 = vmatprep.subr.bf16.mxu1 %v2960_v44 }
  0xb5   :  { %2298 = vmatpush3.bf16.msra.mxu0 %v2960_v44  ;;  %2490 = vmatpush3.bf16.msra.mxu1 %v2960_v44 }
  0xb6   :  { %2300 = vmatprep.subr.bf16.mxu0 %v2967_v54  ;;  %2492 = vmatprep.subr.bf16.mxu1 %v2967_v54 }
  0xb9   :  { %2302 = vmatpush3.bf16.msra.mxu0 %v2967_v54  ;;  %2494 = vmatpush3.bf16.msra.mxu1 %v2967_v54 }
  0xba   :  { %2304 = vmatprep.subr.bf16.mxu0 %v3031_v2  ;;  %2496 = vmatprep.subr.bf16.mxu1 %v3031_v2 }
  0xbc   :  { %1893 = vmatmul.mubr.f32.vlgmr.msra.gmra.mrb[0].mxu0 %v3266_v29  ;;  %2103 = vmatmul.mubr.f32.vlgmr.msra.gmra.mrb[0].mxu1 %v3267_v39 }
  0xbd   :  { %2306 = vmatpush3.bf16.msra.mxu0 %v3031_v2  ;;  %2498 = vmatpush3.bf16.msra.mxu1 %v3031_v2 }
  0xbe   :  { %2308 = vmatprep.subr.bf16.mxu0 %v3037_v11  ;;  %2500 = vmatprep.subr.bf16.mxu1 %v3037_v11 }
  0xbf   :  { %1927 = vmatprep.mubr.f32.mxu0 %v2852_v26  ;;  %2137 = vmatprep.mubr.f32.mxu1 %v2863_v30 }
  0xc1   :  { %2310 = vmatpush3.bf16.msra.mxu0 %v3037_v11  ;;  %2502 = vmatpush3.bf16.msra.mxu1 %v3037_v11 }
  0xc2   :  { %2312 = vmatprep.subr.bf16.mxu0 %v3039_v8  ;;  %2504 = vmatprep.subr.bf16.mxu1 %v3039_v8 }
  0xc5   :  { %2314 = vmatpush3.bf16.msra.mxu0 %v3039_v8  ;;  %2506 = vmatpush3.bf16.msra.mxu1 %v3039_v8 }
  0xc6   :  { %2316 = vmatprep.subr.bf16.mxu0 %v3044_v17  ;;  %2508 = vmatprep.subr.bf16.mxu1 %v3044_v17 }
  0xc9   :  { %2318 = vmatpush3.bf16.msra.mxu0 %v3044_v17  ;;  %2510 = vmatpush3.bf16.msra.mxu1 %v3044_v17 }
  0xca   :  { %2320 = vmatprep.subr.bf16.mxu0 %v3046_v16  ;;  %2512 = vmatprep.subr.bf16.mxu1 %v3046_v16 }
  0xcd   :  { %2322 = vmatpush3.bf16.msra.mxu0 %v3046_v16  ;;  %2514 = vmatpush3.bf16.msra.mxu1 %v3046_v16 }
  0xce   :  { %2324 = vmatprep.subr.bf16.mxu0 %v3048_v57  ;;  %2516 = vmatprep.subr.bf16.mxu1 %v3048_v57 }
  0xd1   :  { %2326 = vmatpush3.bf16.msra.mxu0 %v3048_v57  ;;  %2518 = vmatpush3.bf16.msra.mxu1 %v3048_v57 }
  0xd2   :  { %2328 = vmatprep.subr.bf16.mxu0 %v3050_v3  ;;  %2520 = vmatprep.subr.bf16.mxu1 %v3050_v3 }
  0xd5   :  { %2330 = vmatpush3.bf16.msra.mxu0 %v3050_v3  ;;  %2522 = vmatpush3.bf16.msra.mxu1 %v3050_v3 }
  0xd6   :  { %2332 = vmatprep.subr.bf16.mxu0 %v3052_v14  ;;  %2524 = vmatprep.subr.bf16.mxu1 %v3052_v14 }
  0xd9   :  { %2334 = vmatpush3.bf16.msra.mxu0 %v3052_v14  ;;  %2526 = vmatpush3.bf16.msra.mxu1 %v3052_v14 }
  0xda   :  { %2336 = vmatprep.subr.bf16.mxu0 %v2814_v10  ;;  %2528 = vmatprep.subr.bf16.mxu1 %v2814_v10 }
  0xdc   :  { %1928 = vmatmul.mubr.f32.vlgmr.msra.gmra.mrb[0].mxu0 %v2889_v41  ;;  %2138 = vmatmul.mubr.f32.vlgmr.msra.gmra.mrb[0].mxu1 %v2901_v46 }
  0xdd   :  { %2338 = vmatpush3.bf16.msra.mxu0 %v2814_v10  ;;  %2530 = vmatpush3.bf16.msra.mxu1 %v2814_v10 }
  0xde   :  { %2340 = vmatprep.subr.bf16.mxu0 %v2818_v13  ;;  %2532 = vmatprep.subr.bf16.mxu1 %v2818_v13 }
  0xdf   :  { %1962 = vmatprep.mubr.f32.mxu0 %v2852_v26  ;;  %2172 = vmatprep.mubr.f32.mxu1 %v2863_v30 }
  0xe1   :  { %2342 = vmatpush3.bf16.msra.mxu0 %v2818_v13  ;;  %2534 = vmatpush3.bf16.msra.mxu1 %v2818_v13 }
  0xe2   :  { %2344 = vmatprep.subr.bf16.mxu0 %v2842_v20  ;;  %2536 = vmatprep.subr.bf16.mxu1 %v2842_v20 }
  0xe5   :  { %2346 = vmatpush3.bf16.msra.mxu0 %v2842_v20  ;;  %2538 = vmatpush3.bf16.msra.mxu1 %v2842_v20 }
  0xe6   :  { %2348 = vmatprep.subr.bf16.mxu0 %v2873_v32  ;;  %2540 = vmatprep.subr.bf16.mxu1 %v2873_v32 }
  0xe9   :  { %2350 = vmatpush3.bf16.msra.mxu0 %v2873_v32  ;;  %2542 = vmatpush3.bf16.msra.mxu1 %v2873_v32 }
  0xea   :  { %2352 = vmatprep.subr.bf16.mxu0 %v2909_v47  ;;  %2544 = vmatprep.subr.bf16.mxu1 %v2909_v47 }
  0xed   :  { %2354 = vmatpush3.bf16.msra.mxu0 %v2909_v47  ;;  %2546 = vmatpush3.bf16.msra.mxu1 %v2909_v47 }
  0xee   :  { %2356 = vmatprep.subr.bf16.mxu0 %v2930_v63  ;;  %2548 = vmatprep.subr.bf16.mxu1 %v2930_v63 }
  0xf1   :  { %2358 = vmatpush3.bf16.msra.mxu0 %v2930_v63  ;;  %2550 = vmatpush3.bf16.msra.mxu1 %v2930_v63 }
  0xf2   :  { %2360 = vmatprep.subr.bf16.mxu0 %v2960_v44  ;;  %2552 = vmatprep.subr.bf16.mxu1 %v2960_v44 }
  0xf5   :  { %2362 = vmatpush3.bf16.msra.mxu0 %v2960_v44  ;;  %2554 = vmatpush3.bf16.msra.mxu1 %v2960_v44 }
  0xf6   :  { %2364 = vmatprep.subr.bf16.mxu0 %v2967_v54  ;;  %2556 = vmatprep.subr.bf16.mxu1 %v2967_v54 }
  0xf9   :  { %2366 = vmatpush3.bf16.msra.mxu0 %v2967_v54  ;;  %2558 = vmatpush3.bf16.msra.mxu1 %v2967_v54  ;;  %v3269_v54 = vld [vmem:[#allocation16_spill] sm:$0xff] }
  0xfc   :  { %1963 = vmatmul.mubr.f32.vlgmr.msra.gmra.mrb[0].mxu0 %v2889_v41  ;;  %2173 = vmatmul.mubr.f32.vlgmr.msra.gmra.mrb[0].mxu1 %v2901_v46 }
 0x1cf   :  { %v1964_v10 = vpop.f32.mrb[0].mxu0  ;;  %v2174_v13 = vpop.f32.mrb[0].mxu1 }
 0x1d0   :  { %v2559_v16 = vadd.f32 1e-06, %v1964_v10  ;;  %v2561_v17 = vadd.f32 1e-06, %v2174_v13  ;;  %v759_v20 = vpop.f32.mrb[1].mxu0  ;;  %v1478_v26 = vpop.f32.mrb[1].mxu1 }
 0x1d1   :  { %v2560_v30 = vadd.f32 1e-06, %v759_v20  ;;  %v2562_v32 = vadd.f32 1e-06, %v1478_v26 }
 0x1d2   :  { %2590 = vrsqrt.f32 %v2559_v16 }
 0x1d3   :  { %2592 = vrsqrt.f32 %v2561_v17 }
 0x1d4   :  { %2594 = vrsqrt.f32 %v2560_v30 }
 0x1d5   :  { %2596 = vrsqrt.f32 %v2562_v32 }
 0x1dc   :  { %v2591_v47 = vpop.eup %2590 }
 0x1dd   :  { %v2593_v41 = vpop.eup %2592  ;;  %v772_v46 = vmul.f32 %v2591_v47, %v2834_v19 }
 0x1de   :  { %v2595_v63 = vpop.eup %2594  ;;  %v1491_v6 = vmul.f32 %v2593_v41, %v2846_v23 }
 0x1df   :  { %v2597_v27 = vpop.eup %2596  ;;  %v771_v44 = vmul.f32 %v2595_v63, %v3268_v31  ;;  %v781_v52 = vmul.f32 %v1537_v58, %v772_v46 }
 0x1e0   :  { %v1490_v4 = vmul.f32 %v2597_v27, %v3269_v54  ;;  %v1500_v9 = vmul.f32 %v1538_v62, %v1491_v6 }
 0x1e1   :  { %v780_v18 = vmul.f32 %v1537_v58, %v771_v44  ;;  %783 = vst [vmem:[#allocation8 + $0x8] sm:$0xff] %v781_v52 }
 0x1e2   :  { %v1499_v19 = vmul.f32 %v1538_v62, %v1490_v4  ;;  %1502 = vst [vmem:[#allocation9 + $0x8] sm:$0xff] %v1500_v9 }
 0x1e3   :  { %782 = vst [vmem:[#allocation8] sm:$0xff] %v780_v18 }
 0x1e4   :  { %2675 = shalt.err (!%p2672_p0)
}
 0x1e5   :  { %s2676_s19 = scalar_lea.hbm %s3250_s5, 256 }
 0x1e6   :  { %p2677_p1 = scmp.ne.s32.totalorder %s3250_s5, %s2676_s19  ;;  %p2680_p2 = scmp.lt.u32.totalorder %s2676_s19, %s3250_s5 }
 0x1e8   :  { %p2682_p3 = pnand %p2680_p2, %p2677_p1 }
 0x1ea   :  { %2685 = shalt.err (!%p2682_p3)
}
 0x1eb   :  { %1514 = dma.vmem_to_hbm [thread:$0]  %s1509_s15, 256, %s3250_s5, [#allocation4], %s2718_s9, %s2718_s9, %s2719_s10   ;;  %1501 = vst [vmem:[#allocation9] sm:$0xff] %v1499_v19 }
 0x1ec   :  { %s2686_s26 = scalar_lea.vmem %s3208_s17, 256  ;;  %p2691_p5 = scmp.lt.s32.totalorder %s3208_s17, %s3208_s17 }
 0x1ed   :  { %p2687_p4 = scmp.ne.s32.totalorder %s3208_s17, %s2686_s26  ;;  %p2692_p6 = scmp.lt.s32.totalorder %s2686_s26, %s2686_s26 }
 0x1ef   :  { %p2693_p7 = por %p2692_p6, %p2691_p5 }
 0x1f1   :  { %p2694_p8 = pnand %p2693_p7, %p2687_p4 }
 0x1f3   :  { %2697 = shalt.err (!%p2694_p8)
}
 0x1f4   :  { %s2698_s29 = scalar_lea.hbm %s3251_s6, 256 }
 0x1f5   :  { %p2699_p9 = scmp.ne.s32.totalorder %s3251_s6, %s2698_s29  ;;  %p2702_p10 = scmp.lt.u32.totalorder %s2698_s29, %s3251_s6 }
 0x1f7   :  { %p2704_p11 = pnand %p2702_p10, %p2699_p9 }
 0x1f9   :  { %2707 = shalt.err (!%p2704_p11)
}
 0x1fa   :  { %1526 = dma.vmem_to_hbm [thread:$0]  %s3208_s17, 256, %s3251_s6, [#allocation10], %s2718_s9, %s2718_s9, %s2719_s10  }
 0x1fb   :  { %2712 = dma.done.wait [#allocation4], 256  }
 0x1fc   :  { %2713 = vsyncadd [#allocation4], 4294967040 }
 0x1fd   :  { %2714 = dma.done.wait [#allocation10], 256  }
 0x1fe   :  { %2715 = vsyncadd [#allocation10], 4294967040 }
 0x1ff   :  { %1533 = vsyncpa [#allocation3], 1 }
 0x200   :  { %1534 = vsyncpa [#allocation6], 1 }
 0x201   :  { %1535 = vsyncpa [#allocation4], 1 }
 0x202   :  { %1536 = vsyncpa [#allocation10], 1 }

</bundles_post_ra>
